<compile_context>
chip_gen: v7x
topology: tpu7x:2x2x1
jax: 0.10.0
libtpu: 0.0.40
codegen_flags: <defaults>
</compile_context>

<pallas_src>
import functools

import jax
import jax.numpy as jnp
from jax.experimental import pallas as pl
from jax.experimental.pallas import tpu as pltpu


def _distill_kernel(out_ref, teach_ref, labels_ref, contrib_ref, *,
                    alpha, temperature, n_pad, batch):
    x = out_ref[...].astype(jnp.float32)      # (TB, C)  student logits
    t = teach_ref[...].astype(jnp.float32)    # (TB, Ct) teacher logits (native width)
    lbl = labels_ref[...]                     # (TB, 1)  int32 class ids
    TB, C = x.shape
    Ct = t.shape[1]
    inv_t = 1.0 / temperature                 # static python float (T > 0 asserted)

    # ---- student row max and normalizers (no full-width log-softmax built) ----
    m = jnp.max(x, axis=-1, keepdims=True)                       # (TB, 1)
    z = x - m
    se = jnp.sum(jnp.exp(z), axis=-1, keepdims=True)
    log_se = jnp.log(se)                                         # CE normalizer (T = 1)
    if temperature == 1.0:
        log_ses = log_se                                         # reuse: no second exp pass
    else:
        ses = jnp.sum(jnp.exp(z * inv_t), axis=-1, keepdims=True)  # reuse row max (T > 0)
        log_ses = jnp.log(ses)
    c_s = m * inv_t + log_ses                 # per-row: logp_s_j = x_j*inv_t - c_s

    # ---- cross-entropy directly from the selected logit ----
    cols = jax.lax.broadcasted_iota(jnp.int32, (TB, C), 1)
    x_lbl = jnp.sum(jnp.where(cols == lbl, x, 0.0), axis=-1, keepdims=True)
    ce_row = m + log_se - x_lbl                                  # (TB, 1)

    # ---- teacher softmax at temperature T (zero-padding handled analytically) ----
    ts = t * inv_t
    mt = jnp.max(ts, axis=-1, keepdims=True)
    if n_pad > 0:
        mt = jnp.maximum(mt, 0.0)             # padded teacher logits are exactly 0
    zt = ts - mt
    et = jnp.exp(zt)
    set_real = jnp.sum(et, axis=-1, keepdims=True)               # real classes only
    set_ = set_real
    if n_pad > 0:
        pad_e = jnp.exp(-mt)                  # each padded class contributes exp(0 - mt)
        set_ = set_ + n_pad * pad_e
    inv_set = pl.reciprocal(set_, approx=False)
    log_set = jnp.log(set_)

    # ---- KL over real classes, factored (no pt / log_pt materialized) ----
    if n_pad > 0:
        # Ref-slice load (view before load): no lane-masked copy of the full tile.
        x_ct = out_ref[:, :Ct].astype(jnp.float32)               # (TB, Ct)
    else:
        x_ct = x
    logp_s_ct = x_ct * inv_t - c_s                               # (TB, Ct)
    s1 = jnp.sum(et * (zt - logp_s_ct), axis=-1, keepdims=True)  # (TB, 1)
    kl_row = inv_set * (s1 - log_set * set_real)

    if n_pad > 0:
        # padded classes: identical teacher prob / log-prob per row
        pt_pad = pad_e * inv_set                                  # (TB, 1)
        log_pt_pad = -mt - log_set                                # (TB, 1)
        # sum of student log-probs over padded cols, from row sums of x (no 2nd pass)
        sum_x = jnp.sum(x, axis=-1, keepdims=True)
        sum_x_ct = jnp.sum(x_ct, axis=-1, keepdims=True)
        sum_logp_s_pad = (sum_x - sum_x_ct) * inv_t - n_pad * c_s
        kl_row = kl_row + pt_pad * (n_pad * log_pt_pad - sum_logp_s_pad)

    contrib = (1.0 - alpha) * ce_row + alpha * kl_row            # (TB, 1)

    # ---- mask rows past the true batch (only on the last, partial tile) ----
    if batch % TB != 0:
        rows = pl.program_id(0) * TB + jax.lax.broadcasted_iota(jnp.int32, (TB, 1), 0)
        contrib = jnp.where(rows < batch, contrib, 0.0)

    # per-row contribution; wrapper divides by B (mean CE and batchmean KL share /B)
    contrib_ref[...] = contrib


def _vmem_capacity_bytes():
    try:
        info = pltpu.get_tpu_info()
        cap = getattr(info, "vmem_capacity_bytes", None)
        if cap:
            return int(cap)
    except Exception:
        pass
    return 64 << 20          # conservative default: v7x per-core VMEM


def _pick_tile_rows(B, per_row_bytes, vmem_cap_bytes):
    """Largest row tile (multiple of 8) whose estimated *total* footprint
    (double-buffered raw inputs + f32 temporaries) stays under half of VMEM,
    while keeping enough grid steps for pipelining and v7x's two TensorCores."""
    if B <= 8:
        return B                              # full-extent block is always legal
    budget = vmem_cap_bytes // 2
    tb = max(8, budget // max(per_row_bytes, 1))
    if B >= 64:
        min_steps = 8
    elif B >= 16:
        min_steps = 2
    else:
        min_steps = 1
    tb = min(tb, (B + min_steps - 1) // min_steps)
    tb = max(8, (tb // 8) * 8)                # sublane multiple of 8
    return int(min(tb, B))


def distillation_loss(outputs, labels, teacher_outputs, *, alpha=0.1, temperature=1.0):
    """outputs: (B, C), labels: (B,), teacher_outputs: (B, Ct) with Ct <= C.

    Inputs are passed in their native dtype (e.g. bf16) and cast to f32 inside
    the kernel; no padded teacher copy or f32 copy is ever written to HBM.
    """
    if temperature <= 0:
        raise ValueError("temperature must be > 0")
    B, C = outputs.shape
    Bt, Ct = teacher_outputs.shape
    assert Bt == B, "batch mismatch"
    assert Ct <= C, "teacher must have <= classes than student (module pads teacher)"

    labels2d = labels.astype(jnp.int32).reshape(B, 1)
    itemsize = max(jnp.dtype(outputs.dtype).itemsize,
                   jnp.dtype(teacher_outputs.dtype).itemsize)

    # Per-row VMEM estimate: double-buffered raw inputs + ~8x C-wide and
    # ~4x Ct-wide f32 temporaries materialized by the kernel body.
    per_row = 2 * (C + Ct + 1) * itemsize + (8 * C + 4 * Ct) * 4
    vmem_cap = _vmem_capacity_bytes()
    tb = _pick_tile_rows(B, per_row, vmem_cap)
    grid = (pl.cdiv(B, tb),)

    footprint = per_row * tb
    vmem_limit = int(min((vmem_cap * 7) // 8, max(2 * footprint, 32 << 20)))

    kernel = functools.partial(
        _distill_kernel,
        alpha=float(alpha),
        temperature=float(temperature),
        n_pad=int(C - Ct),
        batch=int(B),
    )

    contrib = pl.pallas_call(
        kernel,
        out_shape=jax.ShapeDtypeStruct((B, 1), jnp.float32),
        grid=grid,
        in_specs=[
            pl.BlockSpec((tb, C), lambda i: (i, 0)),    # student logits tile
            pl.BlockSpec((tb, Ct), lambda i: (i, 0)),   # teacher logits tile (native width)
            pl.BlockSpec((tb, 1), lambda i: (i, 0)),    # labels tile
        ],
        out_specs=pl.BlockSpec((tb, 1), lambda i: (i, 0)),
        compiler_params=pltpu.CompilerParams(
            dimension_semantics=("parallel",),
            vmem_limit_bytes=vmem_limit,
        ),
    )(outputs, teacher_outputs, labels2d)

    return jnp.sum(contrib) / jnp.float32(B)


def _reference(outputs, labels, teacher_outputs, alpha=0.1, temperature=1.0):
    B, C = outputs.shape
    Ct = teacher_outputs.shape[1]
    if Ct != C:
        teacher_outputs = jnp.pad(teacher_outputs, ((0, 0), (0, C - Ct)))
    logp = jax.nn.log_softmax(outputs.astype(jnp.float32), axis=1)
    ce = -jnp.mean(jnp.take_along_axis(logp, labels[:, None], axis=1))
    logp_s = jax.nn.log_softmax(outputs.astype(jnp.float32) / temperature, axis=1)
    pt = jax.nn.softmax(teacher_outputs.astype(jnp.float32) / temperature, axis=1)
    kl = jnp.sum(pt * (jnp.log(pt) - logp_s)) / B
    return (1.0 - alpha) * ce + alpha * kl


if __name__ == "__main__":
    key = jax.random.PRNGKey(0)
    k1, k2, k3, k4, k5, k6, k7 = jax.random.split(key, 7)

    # Case 1: teacher has fewer classes than student -> in-kernel padding path
    B, C, Ct = 8, 128, 120
    outputs = jax.random.normal(k1, (B, C), dtype=jnp.float32)
    teacher_outputs = jax.random.normal(k2, (B, Ct), dtype=jnp.float32)
    labels = jax.random.randint(k3, (B,), 0, C, dtype=jnp.int32)

    loss = distillation_loss(outputs, labels, teacher_outputs, alpha=0.1, temperature=1.0)
    loss = jax.block_until_ready(loss)
    ref = _reference(outputs, labels, teacher_outputs, alpha=0.1, temperature=1.0)
    assert jnp.allclose(loss, ref, rtol=2e-5, atol=2e-5), (loss, ref)

    # Case 2: matching class counts, T != 1 -> no-pad path + temperature branch
    teacher_full = jax.random.normal(k4, (B, C), dtype=jnp.float32)
    loss2 = distillation_loss(outputs, labels, teacher_full, alpha=0.3, temperature=2.0)
    loss2 = jax.block_until_ready(loss2)
    ref2 = _reference(outputs, labels, teacher_full, alpha=0.3, temperature=2.0)
    assert jnp.allclose(loss2, ref2, rtol=2e-5, atol=2e-5), (loss2, ref2)

    # Case 3: batch not divisible by the row tile -> last-tile masking path
    B3 = 20
    outputs3 = jax.random.normal(k5, (B3, C), dtype=jnp.float32)
    teacher3 = jax.random.normal(k6, (B3, Ct), dtype=jnp.float32)
    labels3 = jax.random.randint(k7, (B3,), 0, C, dtype=jnp.int32)
    loss3 = distillation_loss(outputs3, labels3, teacher3, alpha=0.5, temperature=4.0)
    loss3 = jax.block_until_ready(loss3)
    ref3 = _reference(outputs3, labels3, teacher3, alpha=0.5, temperature=4.0)
    assert jnp.allclose(loss3, ref3, rtol=2e-5, atol=2e-5), (loss3, ref3)

    print("KERNEL_OK")
</pallas_src>

<mosaic_0001>
module attributes {stable_mosaic.version = 11 : i64} {
  func.func @_distill_kernel(%arg0: i32, %arg1: memref<8x128xf32, #tpu.memory_space<vmem>>, %arg2: memref<8x120xf32, #tpu.memory_space<vmem>>, %arg3: memref<8x1xi32, #tpu.memory_space<vmem>>, %arg4: memref<8x1xf32, #tpu.memory_space<vmem>>) attributes {dimension_semantics = [#tpu.dimension_semantics<parallel>], iteration_bounds = array<i64: 1>, scalar_prefetch = 0 : i64, scratch_operands = 0 : i64, tpu.core_type = #tpu.core_type<tc>, window_params = [{transform_indices = @transform_0, window_bounds = array<i64: 8, 128>}, {transform_indices = @transform_1, window_bounds = array<i64: 8, 120>}, {transform_indices = @transform_2, window_bounds = array<i64: 8, 1>}, {transform_indices = @transform_3, window_bounds = array<i64: 8, 1>}]} {
    %c0 = arith.constant 0 : index
    %c0_0 = arith.constant 0 : index
    %0 = vector.load %arg1[%c0, %c0_0] : memref<8x128xf32, #tpu.memory_space<vmem>>, vector<8x128xf32>
    %c0_1 = arith.constant 0 : index
    %c0_2 = arith.constant 0 : index
    %1 = vector.load %arg2[%c0_1, %c0_2] : memref<8x120xf32, #tpu.memory_space<vmem>>, vector<8x120xf32>
    %c0_3 = arith.constant 0 : index
    %c0_4 = arith.constant 0 : index
    %2 = vector.load %arg3[%c0_3, %c0_4] : memref<8x1xi32, #tpu.memory_space<vmem>>, vector<8x1xi32>
    %cst = arith.constant dense<0xFF800000> : vector<8xf32>
    %3 = vector.multi_reduction <maximumf>, %0, %cst [1] : vector<8x128xf32> to vector<8xf32>
    %4 = vector.shape_cast %3 : vector<8xf32> to vector<8x1xf32>
    %5 = vector.broadcast %4 : vector<8x1xf32> to vector<8x128xf32>
    %6 = arith.subf %0, %5 : vector<8x128xf32>
    %7 = math.exp %6 : vector<8x128xf32>
    %cst_5 = arith.constant dense<0.000000e+00> : vector<8xf32>
    %8 = vector.multi_reduction <add>, %7, %cst_5 [1] : vector<8x128xf32> to vector<8xf32>
    %9 = vector.shape_cast %8 : vector<8xf32> to vector<8x1xf32>
    %10 = math.log %9 : vector<8x1xf32>
    %cst_6 = arith.constant 1.000000e+00 : f32
    %11 = vector.broadcast %cst_6 : f32 to vector<8x1xf32>
    %12 = arith.mulf %4, %11 : vector<8x1xf32>
    %13 = arith.addf %12, %10 : vector<8x1xf32>
    %14 = tpu.iota {dimensions = array<i32: 1>} : vector<8x128xi32>
    %15 = vector.broadcast %2 : vector<8x1xi32> to vector<8x128xi32>
    %16 = arith.cmpi eq, %14, %15 : vector<8x128xi32>
    %cst_7 = arith.constant 0.000000e+00 : f32
    %17 = vector.broadcast %cst_7 : f32 to vector<8x128xf32>
    %18 = arith.select %16, %0, %17 : vector<8x128xi1>, vector<8x128xf32>
    %cst_8 = arith.constant dense<0.000000e+00> : vector<8xf32>
    %19 = vector.multi_reduction <add>, %18, %cst_8 [1] : vector<8x128xf32> to vector<8xf32>
    %20 = vector.shape_cast %19 : vector<8xf32> to vector<8x1xf32>
    %21 = arith.addf %4, %10 : vector<8x1xf32>
    %22 = arith.subf %21, %20 : vector<8x1xf32>
    %cst_9 = arith.constant 1.000000e+00 : f32
    %23 = vector.broadcast %cst_9 : f32 to vector<8x120xf32>
    %24 = arith.mulf %1, %23 : vector<8x120xf32>
    %cst_10 = arith.constant dense<0xFF800000> : vector<8xf32>
    %25 = vector.multi_reduction <maximumf>, %24, %cst_10 [1] : vector<8x120xf32> to vector<8xf32>
    %26 = vector.shape_cast %25 : vector<8xf32> to vector<8x1xf32>
    %cst_11 = arith.constant 0.000000e+00 : f32
    %27 = vector.broadcast %cst_11 : f32 to vector<8x1xf32>
    %28 = arith.maximumf %26, %27 : vector<8x1xf32>
    %29 = vector.broadcast %28 : vector<8x1xf32> to vector<8x120xf32>
    %30 = arith.subf %24, %29 : vector<8x120xf32>
    %31 = math.exp %30 : vector<8x120xf32>
    %cst_12 = arith.constant dense<0.000000e+00> : vector<8xf32>
    %32 = vector.multi_reduction <add>, %31, %cst_12 [1] : vector<8x120xf32> to vector<8xf32>
    %33 = vector.shape_cast %32 : vector<8xf32> to vector<8x1xf32>
    %cst_13 = arith.constant 0.000000e+00 : f32
    %34 = vector.broadcast %cst_13 : f32 to vector<8x1xf32>
    %35 = arith.subf %34, %28 : vector<8x1xf32>
    %36 = math.exp %35 : vector<8x1xf32>
    %cst_14 = arith.constant 8.000000e+00 : f32
    %37 = vector.broadcast %cst_14 : f32 to vector<8x1xf32>
    %38 = arith.mulf %37, %36 : vector<8x1xf32>
    %39 = arith.addf %33, %38 : vector<8x1xf32>
    %40 = tpu.reciprocal %39 : vector<8x1xf32> -> vector<8x1xf32>
    %41 = math.log %39 : vector<8x1xf32>
    %c0_15 = arith.constant 0 : index
    %c0_16 = arith.constant 0 : index
    %42 = vector.load %arg1[%c0_15, %c0_16] : memref<8x128xf32, #tpu.memory_space<vmem>>, vector<8x120xf32>
    %cst_17 = arith.constant 1.000000e+00 : f32
    %43 = vector.broadcast %cst_17 : f32 to vector<8x120xf32>
    %44 = arith.mulf %42, %43 : vector<8x120xf32>
    %45 = vector.broadcast %13 : vector<8x1xf32> to vector<8x120xf32>
    %46 = arith.subf %44, %45 : vector<8x120xf32>
    %47 = arith.subf %30, %46 : vector<8x120xf32>
    %48 = arith.mulf %31, %47 : vector<8x120xf32>
    %cst_18 = arith.constant dense<0.000000e+00> : vector<8xf32>
    %49 = vector.multi_reduction <add>, %48, %cst_18 [1] : vector<8x120xf32> to vector<8xf32>
    %50 = vector.shape_cast %49 : vector<8xf32> to vector<8x1xf32>
    %51 = arith.mulf %41, %33 : vector<8x1xf32>
    %52 = arith.subf %50, %51 : vector<8x1xf32>
    %53 = arith.mulf %40, %52 : vector<8x1xf32>
    %54 = arith.mulf %36, %40 : vector<8x1xf32>
    %cst_19 = arith.constant 0.000000e+00 : f32
    %55 = vector.broadcast %cst_19 : f32 to vector<8x1xf32>
    %56 = arith.subf %55, %28 : vector<8x1xf32>
    %57 = arith.subf %56, %41 : vector<8x1xf32>
    %cst_20 = arith.constant dense<0.000000e+00> : vector<8xf32>
    %58 = vector.multi_reduction <add>, %0, %cst_20 [1] : vector<8x128xf32> to vector<8xf32>
    %59 = vector.shape_cast %58 : vector<8xf32> to vector<8x1xf32>
    %cst_21 = arith.constant dense<0.000000e+00> : vector<8xf32>
    %60 = vector.multi_reduction <add>, %42, %cst_21 [1] : vector<8x120xf32> to vector<8xf32>
    %61 = vector.shape_cast %60 : vector<8xf32> to vector<8x1xf32>
    %62 = arith.subf %59, %61 : vector<8x1xf32>
    %cst_22 = arith.constant 1.000000e+00 : f32
    %63 = vector.broadcast %cst_22 : f32 to vector<8x1xf32>
    %64 = arith.mulf %62, %63 : vector<8x1xf32>
    %cst_23 = arith.constant 8.000000e+00 : f32
    %65 = vector.broadcast %cst_23 : f32 to vector<8x1xf32>
    %66 = arith.mulf %65, %13 : vector<8x1xf32>
    %67 = arith.subf %64, %66 : vector<8x1xf32>
    %cst_24 = arith.constant 8.000000e+00 : f32
    %68 = vector.broadcast %cst_24 : f32 to vector<8x1xf32>
    %69 = arith.mulf %68, %57 : vector<8x1xf32>
    %70 = arith.subf %69, %67 : vector<8x1xf32>
    %71 = arith.mulf %54, %70 : vector<8x1xf32>
    %72 = arith.addf %53, %71 : vector<8x1xf32>
    %cst_25 = arith.constant 0.899999976 : f32
    %73 = vector.broadcast %cst_25 : f32 to vector<8x1xf32>
    %74 = arith.mulf %73, %22 : vector<8x1xf32>
    %cst_26 = arith.constant 1.000000e-01 : f32
    %75 = vector.broadcast %cst_26 : f32 to vector<8x1xf32>
    %76 = arith.mulf %75, %72 : vector<8x1xf32>
    %77 = arith.addf %74, %76 : vector<8x1xf32>
    %c0_27 = arith.constant 0 : index
    %c0_28 = arith.constant 0 : index
    %78 = vector.load %arg4[%c0_27, %c0_28] : memref<8x1xf32, #tpu.memory_space<vmem>>, vector<8x1xf32>
    tpu.vector_store %arg4[%c0_27, %c0_28], %77 {strides = array<i32>} : memref<8x1xf32, #tpu.memory_space<vmem>>, vector<8x1xf32>,
    return
  }
  func.func @transform_0(%arg0: i32) -> (i32, i32) {
    %c0_i32 = arith.constant 0 : i32
    %c0_i32_0 = arith.constant 0 : i32
    return %arg0, %c0_i32 : i32, i32
  }
  func.func @transform_1(%arg0: i32) -> (i32, i32) {
    %c0_i32 = arith.constant 0 : i32
    %c0_i32_0 = arith.constant 0 : i32
    return %arg0, %c0_i32 : i32, i32
  }
  func.func @transform_2(%arg0: i32) -> (i32, i32) {
    %c0_i32 = arith.constant 0 : i32
    %c0_i32_0 = arith.constant 0 : i32
    return %arg0, %c0_i32 : i32, i32
  }
  func.func @transform_3(%arg0: i32) -> (i32, i32) {
    %c0_i32 = arith.constant 0 : i32
    %c0_i32_0 = arith.constant 0 : i32
    return %arg0, %c0_i32 : i32, i32
  }
}

</mosaic_0001>

<bundles_post_ra>
// kernel: tpu_custom_call.1
= control target key start
LH: loop header
LB: loop body
LE: loop exit
PB: predicated region body
PF: predicated region fallthrough
CT: control target
= control target key end

     0   :  { %8 = vsyncpa [#allocation3], 0  ;;  %s141_s12 = smov [#allocation2]   ;;  %s188_s0 = inlined_call_operand.vmem [shape: f32[8,128], index: 0, kind: input, shape index: {}]   ;;  %s189_s1 = inlined_call_operand.hbm [shape: f32[8,120], index: 1, kind: input, shape index: {}]   ;;  %s190_s2 = inlined_call_operand.vmem [shape: s32[8,1], index: 2, kind: input, shape index: {}]   ;;  %s191_s3 = inlined_call_operand.vmem [shape: f32[8,1], index: 3, kind: output, shape index: {}]  }
   0x1   :  { %s17_s13 = sshll.u32 %s141_s12, 4  ;;  %s117_s16 = scalar_lea.hbm %s189_s1, 128  ;;  %s18_s13 = int_to_ptr.vmem [resolvable:$true] %s17_s13 }
   0x2   :  { %p118_p0 = scmp.ne.s32.totalorder %s189_s1, %s117_s16  ;;  %p121_p1 = scmp.lt.u32.totalorder %s117_s16, %s189_s1 }
   0x4   :  { %p123_p2 = pnand %p121_p1, %p118_p0 }
   0x6   :  { %126 = shalt.err (!%p123_p2)
}
   0x7   :  { %s127_s21 = scalar_lea.vmem %s18_s13, 128  ;;  %p132_p4 = scmp.lt.s32.totalorder %s18_s13, %s18_s13 }
   0x8   :  { %p128_p3 = scmp.ne.s32.totalorder %s18_s13, %s127_s21  ;;  %p133_p5 = scmp.lt.s32.totalorder %s127_s21, %s127_s21 }
   0xa   :  { %p134_p6 = por %p133_p5, %p132_p4 }
   0xc   :  { %p135_p7 = pnand %p134_p6, %p128_p3 }
   0xe   :  { %138 = shalt.err (!%p135_p7)
}
   0xf   :  { %20 = dma.hbm_to_vmem [thread:$0]  %s189_s1, 128, %s18_s13, [#allocation3]  }
  0x10   :  { %139 = dma.done.wait [#allocation3], 128  }
  0x11   :  { %140 = vsyncadd [#allocation3], 4294967168  ;;  %vm49_vm0 = vcmask 982016   ;;  %v26_v0 = vld [vmem:[%s188_s0] sm:$0xff]  ;;  %v142_v3 = vmov 0   ;;  %v39_v16 = vlaneseq  ;;  %vm94_vm2 = vcmask 7168  }
  0x12   :  { %v27_v1 = vld [vmem:[#allocation2] sm:$0xff]  ;;  %29 = vmax.xlane.f32.xlu0 %v26_v0  ;;  %103 = vset.pattern.permute.xlu1 %v142_v3  ;;  %v81_v14 = vsel %vm49_vm0, %v26_v0, 0.0 }
  0x13   :  { %v50_v2 = vsel %vm49_vm0, %v27_v1, -inf  ;;  %104 = vset.pattern.permute.xlu0 %v142_v3  ;;  %v28_v15 = vld [vmem:[%s190_s2] sm:$0xff]  ;;  %v40_v18 = vand.u32 127, %v39_v16 }
  0x16   :  { %51 = vmax.xlane.f32.xlu0 %v50_v2 }
  0x9f   :  { %v30_v4 = vpop.xlane.xlu0 %29 }
  0xa0   :  { %v31_v5 = vsub.f32 %v26_v0, %v30_v4 }
  0xa2   :  { %v32_v6 = vmul.f32 1.442695, %v31_v5 }
  0xa3   :  { %v52_v7 = vpop.xlane.xlu0 %51 }
  0xa4   :  { %v53_v8 = vmax.f32 %v52_v7, 0.0  ;;  %105 = vpow2.f32 %v32_v6 }
  0xa6   :  { %v54_v9 = vsub.f32 %v27_v1, %v53_v8  ;;  %v60_v28 = vsub.f32 0.0, %v53_v8 }
  0xa8   :  { %v55_v10 = vmul.f32 1.442695, %v54_v9  ;;  %v61_v29 = vmul.f32 1.442695, %v60_v28 }
  0xaa   :  { %107 = vpow2.f32 %v55_v10 }
  0xae   :  { %v106_v11 = vpop.eup %105 }
  0xaf   :  { %34 = vadd.xlane.f32.xlu1 %v106_v11 }
  0xb4   :  { %v108_v12 = vpop.eup %107 }
  0xb5   :  { %v57_v13 = vsel %vm49_vm0, %v108_v12, 0.0 }
  0xb6   :  { %58 = vadd.xlane.f32.xlu0 %v57_v13 }
  0xba   :  { %79 = vadd.xlane.f32.xlu0 %v26_v0 }
  0xbe   :  { %82 = vadd.xlane.f32.xlu0 %v81_v14 }
  0xc0   :  { %42 = vperm.xlu1 %103, %v28_v15  }
 0x13c   :  { %v35_v17 = vpop.xlane.xlu1 %34 }
 0x13d   :  { %109 = vlog2.f32 %v35_v17 }
 0x13e   :  { %111 = vpow2.f32 %v61_v29 }
 0x140   :  { %v43_v19 = vpop.permute.xlu1 %42 }
 0x141   :  { %vm44_vm1 = vcmp.eq.s32.totalorder %v40_v18, %v43_v19 }
 0x142   :  { %v45_v20 = vsel %vm44_vm1, %v26_v0, 0.0 }
 0x143   :  { %46 = vadd.xlane.f32.xlu1 %v45_v20  ;;  %v59_v31 = vpop.xlane.xlu0 %58 }
 0x147   :  { %v110_v21 = vpop.eup %109  ;;  %v80_v35 = vpop.xlane.xlu0 %79 }
 0x148   :  { %v37_v22 = vmul.f32 0.6931472, %v110_v21  ;;  %v112_v30 = vpop.eup %111 }
 0x149   :  { %v63_v32 = vmul.f32 8.0, %v112_v30 }
 0x14a   :  { %v38_v23 = vadd.f32 %v37_v22, %v30_v4 }
 0x14b   :  { %v64_v33 = vadd.f32 %v63_v32, %v59_v31  ;;  %v83_v37 = vpop.xlane.xlu0 %82 }
 0x14c   :  { %v68_v24 = vsub.f32 %v26_v0, %v38_v23  ;;  %v85_v39 = vmul.f32 8.0, %v38_v23  ;;  %v84_v40 = vsub.f32 %v80_v35, %v83_v37 }
 0x14d   :  { %113 = vlog2.f32 %v64_v33 }
 0x14e   :  { %v69_v25 = vsub.f32 %v54_v9, %v68_v24  ;;  %115 = vrcp.f32 %v64_v33  ;;  %v86_v42 = vsub.f32 %v84_v40, %v85_v39 }
 0x150   :  { %v70_v26 = vmul.f32 %v108_v12, %v69_v25 }
 0x152   :  { %v71_v27 = vsel %vm49_vm0, %v70_v26, 0.0 }
 0x153   :  { %72 = vadd.xlane.f32.xlu0 %v71_v27 }
 0x157   :  { %v114_v34 = vpop.eup %113 }
 0x158   :  { %v67_v36 = vmul.f32 0.6931472, %v114_v34  ;;  %v116_v43 = vpop.eup %115 }
 0x159   :  { %v77_v48 = vmul.f32 %v116_v43, %v112_v30 }
 0x15a   :  { %v78_v38 = vsub.f32 %v60_v28, %v67_v36  ;;  %v74_v44 = vmul.f32 %v67_v36, %v59_v31 }
 0x15c   :  { %v87_v41 = vmul.f32 8.0, %v78_v38 }
 0x15e   :  { %v88_v45 = vsub.f32 %v87_v41, %v86_v42 }
 0x160   :  { %v89_v51 = vmul.f32 %v88_v45, %v77_v48 }
 0x1d0   :  { %v47_v46 = vpop.xlane.xlu1 %46 }
 0x1d1   :  { %v48_v50 = vsub.f32 %v38_v23, %v47_v46 }
 0x1d3   :  { %v91_v54 = vmul.f32 0.9, %v48_v50 }
 0x1e0   :  { %v73_v47 = vpop.xlane.xlu0 %72 }
 0x1e1   :  { %v75_v49 = vsub.f32 %v73_v47, %v74_v44 }
 0x1e3   :  { %v76_v52 = vmul.f32 %v116_v43, %v75_v49 }
 0x1e5   :  { %v90_v53 = vadd.f32 %v89_v51, %v76_v52 }
 0x1e7   :  { %v92_v55 = vmul.f32 0.1, %v90_v53 }
 0x1e9   :  { %v93_v56 = vadd.f32 %v92_v55, %v91_v54 }
 0x1eb   :  { %95 = vst.msk [vmem:[%s191_s3] sm:$0xff] %vm94_vm2, %v93_v56 }
 0x1ec   :  { %100 = vsyncpa [#allocation3], 1 }

</bundles_post_ra>
